<compile_context>
chip_gen: v7x
topology: tpu7x:2x2x1
jax: 0.10.0
libtpu: 0.0.40
codegen_flags: <defaults>
</compile_context>

<pallas_src>
import jax
import jax.numpy as jnp
from jax.experimental import pallas as pl
from jax.experimental.pallas import tpu as pltpu


# ----------------------------- Pallas kernel ---------------------------------

def _vfe_fused_kernel(x_ref, w1_ref, shift1_ref, w2a_ref, w2b_ref, shift2_ref,
                      out_ref):
    tn, M, CP0 = x_ref.shape          # CP0 = P*C0 (packed input channels)
    CP1 = w1_ref.shape[1]             # P*C1 (= 128 for the default pack)
    CP2 = w2a_ref.shape[1]            # P*C2 (= 128)

    # ---- layer 1: Linear (BN scale pre-folded into w1) -> +shift -> ReLU ----
    x = x_ref[...].reshape(tn * M, CP0)            # merge leading dims (lane dim unchanged)
    y1 = jnp.dot(x, w1_ref[...], preferred_element_type=jnp.float32)
    y1 = jnp.maximum(y1 + shift1_ref[...], 0.0)    # (tn*M, P*C1) f32, full 128-lane epilogue

    # Per-voxel max over the M points.  The reduction is per-lane, so the P
    # packed voxels (block-diagonal weights) stay fully independent.
    agg1 = jnp.max(y1.reshape(tn, M, CP1), axis=1)          # (tn, P*C1)

    # ---- layer 2 on the implicit concat [y1 | repeat(agg1)] (w2 pre-split) ----
    mxu = w2a_ref.dtype
    z_pt = jnp.dot(y1.astype(mxu), w2a_ref[...],
                   preferred_element_type=jnp.float32)      # (tn*M, P*C2)
    z_ag = jnp.dot(agg1.astype(mxu), w2b_ref[...],
                   preferred_element_type=jnp.float32)      # (tn,   P*C2)

    # Per-voxel max BEFORE the epilogue: ReLU is monotone and z_ag/shift2 are
    # constant over M, so max_M relu(z_pt + z_ag + s) == relu(max_M z_pt + z_ag + s).
    zmax = jnp.max(z_pt.reshape(tn, M, CP2), axis=1)        # (tn, P*C2)
    out_ref[...] = jnp.maximum(zmax + z_ag + shift2_ref[...], 0.0)


# ------------------------------ wrapper / glue --------------------------------

def _pick_tile(n_rows):
    # >= 2 balanced grid blocks when possible (keeps both v7x TensorCores busy),
    # <= 256 super-rows per block so the input double-buffer plus the f32
    # intermediates stay well inside v5e's 16 MiB / v7x's 32 MiB scoped-VMEM
    # budgets (the limit is also set explicitly below).  Round to sublane (8).
    max_tile = 256
    n_blocks = max(2, pl.cdiv(n_rows, max_tile))
    tile = pl.cdiv(n_rows, n_blocks)
    tile = -(-tile // 8) * 8
    return int(max(8, min(tile, max_tile)))


def vfe_forward(fused, voxel_feats):
    """Fused 2-layer VFE forward.

    fused: dict from VFEParams.fused_params() (lane-packed, BN-folded weights).
    voxel_feats: (N, M, C0) float32.  Returns (N, C2) float32.
    """
    N, M, C0 = voxel_feats.shape
    assert fused["w1"].shape[0] % C0 == 0
    P = fused["w1"].shape[0] // C0           # voxels packed per 128-lane group
    CP1 = fused["w1"].shape[1]               # P * C1
    CP2 = fused["w2a"].shape[1]              # P * C2
    C2 = CP2 // P

    n_sr = pl.cdiv(N, P)                     # super-rows before tile padding
    tn = _pick_tile(n_sr)
    n_sr_pad = pl.cdiv(n_sr, tn) * tn
    n_pad = n_sr_pad * P

    x = voxel_feats
    if n_pad != N:
        # Ragged voxel counts: zero-pad; padded rows are independent (block-diag
        # weights) and sliced off below.
        x = jnp.pad(x, ((0, n_pad - N), (0, 0), (0, 0)))
    # Pack P consecutive voxels into the lane axis: (N, M, C0) -> (N/P, M, P*C0).
    # pad + pack + dtype cast fuse into a single XLA pass under jit; the kernel
    # then sees lane-dense 128-wide work everywhere and bf16-sized input DMA.
    x = (x.reshape(n_sr_pad, P, M, C0)
          .transpose(0, 2, 1, 3)
          .reshape(n_sr_pad, M, P * C0)
          .astype(fused["w1"].dtype))

    # TODO(synk): for very large N, in_specs[0] could use pipeline_mode=pl.Buffered(3)
    # if a profile shows the input DMA exposed; not worth it at these sizes.
    out = pl.pallas_call(
        _vfe_fused_kernel,
        out_shape=jax.ShapeDtypeStruct((n_sr_pad, CP2), jnp.float32),
        grid_spec=pltpu.PrefetchScalarGridSpec(
            num_scalar_prefetch=0,
            grid=(n_sr_pad // tn,),
            in_specs=[
                pl.BlockSpec((tn, M, P * C0), lambda i: (i, 0, 0)),  # packed voxel tile
                pl.BlockSpec((P * C0, CP1), lambda i: (0, 0)),       # block-diag w1*bn1_scale
                pl.BlockSpec((1, CP1), lambda i: (0, 0)),            # tiled bn1 shift
                pl.BlockSpec((CP1, CP2), lambda i: (0, 0)),          # block-diag w2[:C1]*bn2_scale
                pl.BlockSpec((CP1, CP2), lambda i: (0, 0)),          # block-diag w2[C1:]*bn2_scale
                pl.BlockSpec((1, CP2), lambda i: (0, 0)),            # tiled bn2 shift
            ],
            out_specs=pl.BlockSpec((tn, CP2), lambda i: (i, 0)),     # lane-dense (tn, 128)
        ),
        compiler_params=pltpu.CompilerParams(
            dimension_semantics=("parallel",),        # shard voxel tiles across TCs
            vmem_limit_bytes=32 * 1024 * 1024,        # explicit; safe on v5e/v6e/v7x
        ),
    )(x, fused["w1"], fused["shift1"], fused["w2a"], fused["w2b"], fused["shift2"])

    # Unpack lanes back to voxels: (N/P, P*C2) -> (N, C2); drop padding.
    return out.reshape(n_sr_pad * P, C2)[:N]


class VFEParams:
    """Deterministic synthetic parameters mirroring the torch module's __init__.

    Synthetic config: in_channels=4, with_cluster_center=True, with_voxel_center=True,
    with_distance=False -> effective in_channels=10; feat_channels=[32, 32];
    BN eps=1e-3; fusion_layer=None.  fp16_enabled is False in the torch module, so the
    @auto_fp16/@force_fp32 decorators are no-ops; the reference path is float32.
    """

    def __init__(self, key, in_channels=10, feat_channels=(32, 32), eps=1e-3):
        self.eps = eps
        chans = [in_channels] + list(feat_channels)
        self.layers = []
        for i in range(len(chans) - 1):
            cin = chans[i] * (2 if i > 0 else 1)
            cout = chans[i + 1]
            last = i == len(chans) - 2
            key, k_w, k_g, k_b, k_m, k_v = jax.random.split(key, 6)
            w = jax.random.normal(k_w, (cin, cout), jnp.float32) * 0.05
            gamma = 1.0 + 0.1 * jax.random.normal(k_g, (cout,), jnp.float32)
            beta = 0.1 * jax.random.normal(k_b, (cout,), jnp.float32)
            mean = 0.1 * jax.random.normal(k_m, (cout,), jnp.float32)
            var = 0.5 + jnp.abs(jax.random.normal(k_v, (cout,), jnp.float32))
            # Fold eval-mode BatchNorm1d running stats into per-channel scale/shift.
            scale = (gamma / jnp.sqrt(var + eps)).reshape(1, cout)
            shift = (beta - mean * gamma / jnp.sqrt(var + eps)).reshape(1, cout)
            self.layers.append(dict(w=w, scale=scale, shift=shift,
                                    max_out=True, cat_max=not last))

    def fused_params(self, *, pack=4, use_bf16_matmul=True):
        """BN-folded, cat_max-split, block-diagonal lane-packed kernel weights.

        pack=4 voxels x 32 channels fill the 128-lane vreg exactly, so the whole
        epilogue, both max reductions and the output store are lane-dense.
        """
        assert len(self.layers) == 2, "fused kernel covers the standard 2-layer VFE"
        # TODO(synk): configs with >2 VFE layers or fusion_layer!=None would need a
        # generic per-layer kernel; the synthetic config matches the torch default.
        l1, l2 = self.layers
        assert l1["max_out"] and l1["cat_max"] and l2["max_out"] and not l2["cat_max"]
        c1 = l1["w"].shape[1]
        mxu_dtype = jnp.bfloat16 if use_bf16_matmul else jnp.float32
        eye = jnp.eye(pack, dtype=jnp.float32)
        w1 = l1["w"] * l1["scale"]                           # (C0, C1)
        w2 = l2["w"] * l2["scale"]                           # (2*C1, C2)
        return dict(
            w1=jnp.kron(eye, w1).astype(mxu_dtype),          # (P*C0, P*C1) block-diag
            shift1=jnp.tile(l1["shift"], (1, pack)).astype(jnp.float32),
            w2a=jnp.kron(eye, w2[:c1]).astype(mxu_dtype),    # acts on pointwise y1
            w2b=jnp.kron(eye, w2[c1:]).astype(mxu_dtype),    # acts on per-voxel max
            shift2=jnp.tile(l2["shift"], (1, pack)).astype(jnp.float32),
        )


# --------------------------- pure-JAX reference -------------------------------

def _vfe_layer_ref(x, w, scale, shift, max_out, cat_max):
    y = jnp.einsum("nmc,cd->nmd", x, w)
    y = jnp.maximum(y * scale + shift, 0.0)
    if not max_out:
        return y
    agg = jnp.max(y, axis=1, keepdims=True)
    if cat_max:
        return jnp.concatenate([y, jnp.broadcast_to(agg, y.shape)], axis=2)
    return agg[:, 0, :]


def vfe_forward_ref(params, voxel_feats):
    x = voxel_feats
    for layer in params.layers:
        x = _vfe_layer_ref(x, layer["w"], layer["scale"], layer["shift"],
                           layer["max_out"], layer["cat_max"])
    return x


if __name__ == "__main__":
    key = jax.random.PRNGKey(0)
    key, k_x = jax.random.split(key)

    N, M, C = 64, 16, 10          # voxels, points per voxel, point-feature channels
    voxel_feats = jax.random.normal(k_x, (N, M, C), jnp.float32)
    params = VFEParams(key)

    ref = vfe_forward_ref(params, voxel_feats)
    fwd = jax.jit(vfe_forward)

    # f32 MXU path (matches the torch module's fp32 forward; packing/max-reorder exact).
    out = jax.block_until_ready(
        fwd(params.fused_params(use_bf16_matmul=False), voxel_feats))
    assert out.shape == (N, 32), out.shape
    assert jnp.allclose(out, ref, atol=1e-4, rtol=1e-4), "f32 mismatch vs reference"

    # Default production path: bf16 MXU operands (half the input DMA bytes, native
    # MXU rate on v6e/v7x), f32 accumulation and BN/ReLU/max epilogue.
    out_bf16 = jax.block_until_ready(
        fwd(params.fused_params(use_bf16_matmul=True), voxel_feats))
    assert jnp.allclose(out_bf16, ref, atol=5e-2, rtol=5e-2), "bf16 mismatch vs reference"

    print("KERNEL_OK")
</pallas_src>

<mosaic_0001>
module attributes {stable_mosaic.version = 11 : i64} {
  func.func @_vfe_fused_kernel(%arg0: i32, %arg1: memref<8x16x40xf32, #tpu.memory_space<vmem>>, %arg2: memref<40x128xf32, #tpu.memory_space<vmem>>, %arg3: memref<1x128xf32, #tpu.memory_space<vmem>>, %arg4: memref<128x128xf32, #tpu.memory_space<vmem>>, %arg5: memref<128x128xf32, #tpu.memory_space<vmem>>, %arg6: memref<1x128xf32, #tpu.memory_space<vmem>>, %arg7: memref<8x128xf32, #tpu.memory_space<vmem>>) attributes {dimension_semantics = [#tpu.dimension_semantics<parallel>], iteration_bounds = array<i64: 2>, scalar_prefetch = 0 : i64, scratch_operands = 0 : i64, tpu.core_type = #tpu.core_type<tc>, window_params = [{transform_indices = @transform_0, window_bounds = array<i64: 8, 16, 40>}, {pipeline_mode = #tpu.pipeline_mode<synchronous>, transform_indices = @transform_1, window_bounds = array<i64: 40, 128>}, {pipeline_mode = #tpu.pipeline_mode<synchronous>, transform_indices = @transform_2, window_bounds = array<i64: 1, 128>}, {pipeline_mode = #tpu.pipeline_mode<synchronous>, transform_indices = @transform_3, window_bounds = array<i64: 128, 128>}, {pipeline_mode = #tpu.pipeline_mode<synchronous>, transform_indices = @transform_4, window_bounds = array<i64: 128, 128>}, {pipeline_mode = #tpu.pipeline_mode<synchronous>, transform_indices = @transform_5, window_bounds = array<i64: 1, 128>}, {transform_indices = @transform_6, window_bounds = array<i64: 8, 128>}]} {
    %c0 = arith.constant 0 : index
    %c0_0 = arith.constant 0 : index
    %c0_1 = arith.constant 0 : index
    %0 = vector.load %arg1[%c0, %c0_0, %c0_1] : memref<8x16x40xf32, #tpu.memory_space<vmem>>, vector<8x16x40xf32>
    %1 = vector.shape_cast %0 : vector<8x16x40xf32> to vector<128x40xf32>
    %c0_2 = arith.constant 0 : index
    %c0_3 = arith.constant 0 : index
    %2 = vector.load %arg2[%c0_2, %c0_3] : memref<40x128xf32, #tpu.memory_space<vmem>>, vector<40x128xf32>
    %cst = arith.constant dense<0.000000e+00> : vector<128x128xf32>
    %3 = tpu.matmul %1, %2, %cst {dimension_numbers = #tpu.dot_dimension_numbers<[1], [0], [0], [1], [0, 0, 1, 1], [], []>} : vector<128x40xf32>, vector<40x128xf32>, vector<128x128xf32> -> vector<128x128xf32>
    %c0_4 = arith.constant 0 : index
    %c0_5 = arith.constant 0 : index
    %4 = vector.load %arg3[%c0_4, %c0_5] : memref<1x128xf32, #tpu.memory_space<vmem>>, vector<1x128xf32>
    %5 = vector.broadcast %4 : vector<1x128xf32> to vector<128x128xf32>
    %6 = arith.addf %3, %5 : vector<128x128xf32>
    %cst_6 = arith.constant 0.000000e+00 : f32
    %7 = vector.broadcast %cst_6 : f32 to vector<128x128xf32>
    %8 = arith.maximumf %6, %7 : vector<128x128xf32>
    %9 = vector.shape_cast %8 : vector<128x128xf32> to vector<8x16x128xf32>
    %cst_7 = arith.constant dense<0xFF800000> : vector<8x128xf32>
    %10 = vector.multi_reduction <maximumf>, %9, %cst_7 [1] : vector<8x16x128xf32> to vector<8x128xf32>
    %c0_8 = arith.constant 0 : index
    %c0_9 = arith.constant 0 : index
    %11 = vector.load %arg4[%c0_8, %c0_9] : memref<128x128xf32, #tpu.memory_space<vmem>>, vector<128x128xf32>
    %cst_10 = arith.constant dense<0.000000e+00> : vector<128x128xf32>
    %12 = tpu.matmul %8, %11, %cst_10 {dimension_numbers = #tpu.dot_dimension_numbers<[1], [0], [0], [1], [0, 0, 1, 1], [], []>} : vector<128x128xf32>, vector<128x128xf32>, vector<128x128xf32> -> vector<128x128xf32>
    %c0_11 = arith.constant 0 : index
    %c0_12 = arith.constant 0 : index
    %13 = vector.load %arg5[%c0_11, %c0_12] : memref<128x128xf32, #tpu.memory_space<vmem>>, vector<128x128xf32>
    %cst_13 = arith.constant dense<0.000000e+00> : vector<8x128xf32>
    %14 = tpu.matmul %10, %13, %cst_13 {dimension_numbers = #tpu.dot_dimension_numbers<[1], [0], [0], [1], [0, 0, 1, 1], [], []>} : vector<8x128xf32>, vector<128x128xf32>, vector<8x128xf32> -> vector<8x128xf32>
    %15 = vector.shape_cast %12 : vector<128x128xf32> to vector<8x16x128xf32>
    %cst_14 = arith.constant dense<0xFF800000> : vector<8x128xf32>
    %16 = vector.multi_reduction <maximumf>, %15, %cst_14 [1] : vector<8x16x128xf32> to vector<8x128xf32>
    %17 = arith.addf %16, %14 : vector<8x128xf32>
    %c0_15 = arith.constant 0 : index
    %c0_16 = arith.constant 0 : index
    %18 = vector.load %arg6[%c0_15, %c0_16] : memref<1x128xf32, #tpu.memory_space<vmem>>, vector<1x128xf32>
    %19 = vector.broadcast %18 : vector<1x128xf32> to vector<8x128xf32>
    %20 = arith.addf %17, %19 : vector<8x128xf32>
    %cst_17 = arith.constant 0.000000e+00 : f32
    %21 = vector.broadcast %cst_17 : f32 to vector<8x128xf32>
    %22 = arith.maximumf %20, %21 : vector<8x128xf32>
    %c0_18 = arith.constant 0 : index
    %c0_19 = arith.constant 0 : index
    %23 = vector.load %arg7[%c0_18, %c0_19] : memref<8x128xf32, #tpu.memory_space<vmem>>, vector<8x128xf32>
    tpu.vector_store %arg7[%c0_18, %c0_19], %22 {strides = array<i32>} : memref<8x128xf32, #tpu.memory_space<vmem>>, vector<8x128xf32>,
    return
  }
  func.func @transform_0(%arg0: i32) -> (i32, i32, i32) {
    %c0_i32 = arith.constant 0 : i32
    %c0_i32_0 = arith.constant 0 : i32
    %c0_i32_1 = arith.constant 0 : i32
    return %arg0, %c0_i32, %c0_i32_0 : i32, i32, i32
  }
  func.func @transform_1(%arg0: i32) -> (i32, i32) {
    %c0_i32 = arith.constant 0 : i32
    %c0_i32_0 = arith.constant 0 : i32
    %c0_i32_1 = arith.constant 0 : i32
    return %c0_i32, %c0_i32_0 : i32, i32
  }
  func.func @transform_2(%arg0: i32) -> (i32, i32) {
    %c0_i32 = arith.constant 0 : i32
    %c0_i32_0 = arith.constant 0 : i32
    %c0_i32_1 = arith.constant 0 : i32
    return %c0_i32, %c0_i32_0 : i32, i32
  }
  func.func @transform_3(%arg0: i32) -> (i32, i32) {
    %c0_i32 = arith.constant 0 : i32
    %c0_i32_0 = arith.constant 0 : i32
    %c0_i32_1 = arith.constant 0 : i32
    return %c0_i32, %c0_i32_0 : i32, i32
  }
  func.func @transform_4(%arg0: i32) -> (i32, i32) {
    %c0_i32 = arith.constant 0 : i32
    %c0_i32_0 = arith.constant 0 : i32
    %c0_i32_1 = arith.constant 0 : i32
    return %c0_i32, %c0_i32_0 : i32, i32
  }
  func.func @transform_5(%arg0: i32) -> (i32, i32) {
    %c0_i32 = arith.constant 0 : i32
    %c0_i32_0 = arith.constant 0 : i32
    %c0_i32_1 = arith.constant 0 : i32
    return %c0_i32, %c0_i32_0 : i32, i32
  }
  func.func @transform_6(%arg0: i32) -> (i32, i32) {
    %c0_i32 = arith.constant 0 : i32
    %c0_i32_0 = arith.constant 0 : i32
    return %arg0, %c0_i32 : i32, i32
  }
}

</mosaic_0001>

<bundles_post_ra>
// kernel: vfe_forward.1
= control target key start
LH: loop header
LB: loop body
LE: loop exit
PB: predicated region body
PF: predicated region fallthrough
CT: control target
= control target key end

     0   :  { %s1345_s21 = smov 0   ;;  %s1552_s0 = inlined_call_operand.vmem [shape: f32[16,16,40], index: 0, kind: input, shape index: {}]   ;;  %s1553_s1 = inlined_call_operand.vmem [shape: f32[40,128], index: 1, kind: input, shape index: {}]   ;;  %s1554_s2 = inlined_call_operand.vmem [shape: f32[1,128], index: 2, kind: input, shape index: {}]   ;;  %s1555_s3 = inlined_call_operand.vmem [shape: f32[128,128], index: 3, kind: input, shape index: {}]   ;;  %s1556_s4 = inlined_call_operand.vmem [shape: f32[128,128], index: 4, kind: input, shape index: {}]   ;;  %s1557_s5 = inlined_call_operand.vmem [shape: f32[1,128], index: 5, kind: input, shape index: {}]   ;;  %s1558_s6 = inlined_call_operand.vmem [shape: f32[16,128], index: 6, kind: output, shape index: {}]  }
   0x1 LB: > { %s1351_s22 = sadd.s32 4294967295, %s1305_s21   ;;  %p1003_p0 = scmp.ge.s32.totalorder %s1305_s21, 1  ;;  %s1305_s21 = sphi %s1345_s21, %s16_s21  }
   0x2   : > { %p214_p1 = scmp.lt.s32.totalorder %s1305_s21, 3 }
   0x4   : > { %p215_p2 = pnand %p1003_p0, %p214_p1 }
   0x5   : > { %v271_v0 = vld [vmem:[%s1553_s1] sm:$0xff] (!%p215_p2)  ;;  %v272_v1 = vld [vmem:[%s1553_s1 + $0x8] sm:$0xff] (!%p215_p2)  ;;  %v273_v2 = vld [vmem:[%s1553_s1 + $0x10] sm:$0xff] (!%p215_p2)  ;;  %s1004_s29 = sshll.u32 (!%p215_p2), %s1351_s22, 3  ;;  %vm283_vm0 = vcmask (!%p215_p2), 326656   ;;  %v1307_v49 = vmov (!%p215_p2), 0.0|0.0  }
   0x6   : > { %218 = sbr.rel (%p215_p2) target bundleno = 508 (0x1fc), region = 44  ;;  %v1224_v3 = vpack.c.bf16 (!%p215_p2), %v272_v1, %v271_v0  ;;  %v274_v4 = vld [vmem:[%s1553_s1 + $0x18] sm:$0xff] (!%p215_p2)  ;;  %p245_p3 = scmp.lt.s32.totalorder (!%p215_p2), %s1004_s29, 15  ;;  %v549_v5 = vld [vmem:[%s1555_s3] sm:$0xff] (!%p215_p2)  ;;  %v550_v7 = vld [vmem:[%s1555_s3 + $0x8] sm:$0xff] (!%p215_p2)  ;;  %vm1308_vm1 = vmmov (!%p215_p2), 0  }
   0x7   : > { %v1228_v6 = vpack.c.bf16 (!%p215_p2), %v274_v4, %v273_v2  ;;  %v551_v8 = vld [vmem:[%s1555_s3 + $0x10] sm:$0xff] (!%p215_p2)  ;;  %v552_v9 = vld [vmem:[%s1555_s3 + $0x18] sm:$0xff] (!%p215_p2)  ;;  %v1232_v10 = vpack.c.bf16 (!%p215_p2), %v550_v7, %v549_v5  ;;  %v553_v12 = vld [vmem:[%s1555_s3 + $0x20] sm:$0xff] (!%p215_p2)  ;;  %vm734_vm2 = vcmask (!%p215_p2), 1041409   ;;  %vm736_vm3 = vcmask (!%p215_p2), 1042434   ;;  %p251_p4 = scmp.lt.s32.totalorder (!%p215_p2), %s1351_s22, 1 }
   0x8   : > { %1225 = vmatprep.subr.bf16.mxu0 (!%p215_p2), %v1224_v3  ;;  %v1236_v11 = vpack.c.bf16 (!%p215_p2), %v552_v9, %v551_v8  ;;  %v554_v13 = vld [vmem:[%s1555_s3 + $0x28] sm:$0xff] (!%p215_p2)  ;;  %v275_v14 = vld [vmem:[%s1553_s1 + $0x20] sm:$0xff] (!%p215_p2)  ;;  %v555_v17 = vld [vmem:[%s1555_s3 + $0x30] sm:$0xff] (!%p215_p2)  ;;  %v1309_v8 = vmov (!%p215_p2), 0.0   ;;  %vm738_vm4 = vcmask (!%p215_p2), 1043459   ;;  %vm740_vm5 = vcmask (!%p215_p2), 1044484  }
   0x9   : > { %1227 = vmatpush3.bf16.msra.mxu0 (!%p215_p2), %v1224_v3  ;;  %1233 = vmatprep.subr.bf16.mxu1 (!%p215_p2), %v1232_v10  ;;  %v1240_v16 = vpack.c.bf16 (!%p215_p2), %v554_v13, %v553_v12  ;;  %v556_v18 = vld [vmem:[%s1555_s3 + $0x38] sm:$0xff] (!%p215_p2)  ;;  %v557_v22 = vld [vmem:[%s1555_s3 + $0x40] sm:$0xff] (!%p215_p2)  ;;  %v558_v23 = vld [vmem:[%s1555_s3 + $0x48] sm:$0xff] (!%p215_p2)  ;;  %vm742_vm6 = vcmask (!%p215_p2), 1045509   ;;  %vm744_vm7 = vcmask (!%p215_p2), 1046534   ;;  %vm746_vm8 = vcmask (!%p215_p2), 1047559  }
   0xa   : > { %1229 = vmatprep.subr.bf16.mxu0 (!%p215_p2), %v1228_v6  ;;  %1235 = vmatpush3.bf16.msra.mxu1 (!%p215_p2), %v1232_v10  ;;  %v1244_v21 = vpack.c.bf16 (!%p215_p2), %v556_v18, %v555_v17  ;;  %v1248_v26 = vpack.c.bf16 (!%p215_p2), %v558_v23, %v557_v22  ;;  %v559_v27 = vld [vmem:[%s1555_s3 + $0x50] sm:$0xff] (!%p215_p2)  ;;  %v560_v28 = vld [vmem:[%s1555_s3 + $0x58] sm:$0xff] (!%p215_p2)  ;;  %v561_v32 = vld [vmem:[%s1555_s3 + $0x60] sm:$0xff] (!%p215_p2) }
   0xb   : > { %1237 = vmatprep.subr.bf16.mxu1 (!%p215_p2), %v1236_v11  ;;  %v1252_v31 = vpack.c.bf16 (!%p215_p2), %v560_v28, %v559_v27  ;;  %v562_v33 = vld [vmem:[%s1555_s3 + $0x68] sm:$0xff] (!%p215_p2)  ;;  %v563_v44 = vld [vmem:[%s1555_s3 + $0x70] sm:$0xff] (!%p215_p2)  ;;  %v564_v45 = vld [vmem:[%s1555_s3 + $0x78] sm:$0xff] (!%p215_p2) }
   0xc   : > { %v1256_v36 = vpack.c.bf16 (!%p215_p2), %v562_v33, %v561_v32  ;;  %v1260_v46 = vpack.c.bf16 (!%p215_p2), %v564_v45, %v563_v44  ;;  %v710_v47 = vld [vmem:[%s1556_s4] sm:$0xff] (!%p215_p2)  ;;  %v711_v48 = vld [vmem:[%s1556_s4 + $0x8] sm:$0xff] (!%p215_p2)  ;;  %v712_v51 = vld [vmem:[%s1556_s4 + $0x10] sm:$0xff] (!%p215_p2) }
   0xd   : > { %s1560_s29 = smov (!%p245_p3, %s1004_s29), 15  ;;  %1231 = vmatpush3.bf16.msra.mxu0 %v1228_v6  ;;  %v1265_v50 = vpack.c.bf16 %v711_v48, %v710_v47  ;;  %v713_v52 = vld [vmem:[%s1556_s4 + $0x18] sm:$0xff]  ;;  %v714_v54 = vld [vmem:[%s1556_s4 + $0x20] sm:$0xff]  ;;  %v715_v55 = vld [vmem:[%s1556_s4 + $0x28] sm:$0xff]  ;;  %s1562_s22 = smov (!%p251_p4, %s1351_s22), 1 }
   0xe   : > { %s1028_s20 = sshll.u32 %s1560_s29, 4  ;;  %1107 = vmatprep.subr.mxu0 %v275_v14  ;;  %1239 = vmatpush3.bf16.msra.mxu1 %v1236_v11  ;;  %v1268_v53 = vpack.c.bf16 %v713_v52, %v712_v51  ;;  %v1271_v56 = vpack.c.bf16 %v715_v55, %v714_v54  ;;  %v716_v57 = vld [vmem:[%s1556_s4 + $0x30] sm:$0xff]  ;;  %v717_v58 = vld [vmem:[%s1556_s4 + $0x38] sm:$0xff]  ;;  %v718_v60 = vld [vmem:[%s1556_s4 + $0x40] sm:$0xff]  ;;  %s1007_s16 = sshll.u32 %s1562_s22, 3 }
   0xf   : > { %s1392_s27 = scalar_lea.vmem %s1552_s0, %s1028_s20  ;;  %1241 = vmatprep.subr.bf16.mxu1 %v1240_v16  ;;  %v1274_v59 = vpack.c.bf16 %v717_v58, %v716_v57  ;;  %v719_v61 = vld [vmem:[%s1556_s4 + $0x48] sm:$0xff]  ;;  %v720_v63 = vld [vmem:[%s1556_s4 + $0x50] sm:$0xff]  ;;  %v721_v0 = vld [vmem:[%s1556_s4 + $0x58] sm:$0xff]  ;;  %s254_s19 = scalar_lea.vmem %s1558_s6, %s1007_s16 }
  0x10   : > { %v255_v15 = vld [vmem:[%s1392_s27] sm:$0xff]  ;;  %v256_v19 = vld [vmem:[%s1392_s27 + $0x8] sm:$0xff]  ;;  %v257_v20 = vld [vmem:[%s1392_s27 + $0x10] sm:$0xff]  ;;  %v1277_v62 = vpack.c.bf16 %v719_v61, %v718_v60  ;;  %v1280_v1 = vpack.c.bf16 %v721_v0, %v720_v63 }
  0x11   : > { %1109 = vmatprep.mubr.msk.f32.mxu0 %vm283_vm0, %v255_v15  ;;  %1108 = vmatpush3.msra.mxu0 %v275_v14  ;;  %v258_v24 = vld [vmem:[%s1392_s27 + $0x18] sm:$0xff]  ;;  %v259_v25 = vld [vmem:[%s1392_s27 + $0x20] sm:$0xff]  ;;  %v260_v29 = vld [vmem:[%s1392_s27 + $0x28] sm:$0xff] }
  0x12   : > { %1110 = vmatmul.mubr.msk.f32.vlgmr.msra.gmra.mrb[0].mxu0 %vm283_vm0, %v256_v19  ;;  %1243 = vmatpush3.bf16.msra.mxu1 %v1240_v16  ;;  %v261_v30 = vld [vmem:[%s1392_s27 + $0x30] sm:$0xff]  ;;  %v262_v34 = vld [vmem:[%s1392_s27 + $0x38] sm:$0xff]  ;;  %v263_v35 = vld [vmem:[%s1392_s27 + $0x40] sm:$0xff] }
  0x13   : > { %1112 = vmatprep.mubr.msk.f32.mxu0 %vm283_vm0, %v257_v20  ;;  %1245 = vmatprep.subr.bf16.mxu1 %v1244_v21  ;;  %v264_v37 = vld [vmem:[%s1392_s27 + $0x48] sm:$0xff]  ;;  %v265_v38 = vld [vmem:[%s1392_s27 + $0x50] sm:$0xff]  ;;  %v266_v39 = vld [vmem:[%s1392_s27 + $0x58] sm:$0xff] }
  0x14   : > { %v267_v40 = vld [vmem:[%s1392_s27 + $0x60] sm:$0xff]  ;;  %v268_v41 = vld [vmem:[%s1392_s27 + $0x68] sm:$0xff]  ;;  %v269_v42 = vld [vmem:[%s1392_s27 + $0x70] sm:$0xff]  ;;  %1264 = vmatprep.subr.bf16.mxu0 %v1307_v49 }
  0x15   : > { %v270_v43 = vld [vmem:[%s1392_s27 + $0x78] sm:$0xff]  ;;  %1266 = vmatpush3.bf16.msra.mxu0 %v1265_v50  ;;  %v722_v2 = vld [vmem:[%s1556_s4 + $0x60] sm:$0xff]  ;;  %v723_v3 = vld [vmem:[%s1556_s4 + $0x68] sm:$0xff] }
  0x16   : > { %1113 = vmatmul.mubr.msk.f32.gmra.mrb[2].mxu0 %vm283_vm0, %v258_v24  ;;  %1247 = vmatpush3.bf16.msra.mxu1 %v1244_v21  ;;  %v1283_v4 = vpack.c.bf16 %v723_v3, %v722_v2  ;;  %v724_v5 = vld [vmem:[%s1556_s4 + $0x70] sm:$0xff]  ;;  %v725_v6 = vld [vmem:[%s1556_s4 + $0x78] sm:$0xff]  ;;  %v1507_v9 = vld [vmem:[%s1554_s2] ss:$0 sm:$0xff] }
  0x17   : > { %1115 = vmatprep.mubr.msk.f32.mxu0 %vm283_vm0, %v259_v25  ;;  %1249 = vmatprep.subr.bf16.mxu1 %v1248_v26  ;;  %v1286_v7 = vpack.c.bf16 %v725_v6, %v724_v5 }
  0x18   : > { %1267 = vmatprep.subr.bf16.mxu0 %v1307_v49 }
  0x19   : > { %1269 = vmatpush3.bf16.msra.mxu0 %v1268_v53 }
  0x1a   : > { %1116 = vmatmul.mubr.msk.f32.gmra.mrb[4].mxu0 %vm283_vm0, %v260_v29  ;;  %1251 = vmatpush3.bf16.msra.mxu1 %v1248_v26 }
  0x1b   : > { %1118 = vmatprep.mubr.msk.f32.mxu0 %vm283_vm0, %v261_v30  ;;  %1253 = vmatprep.subr.bf16.mxu1 %v1252_v31 }
  0x1c   : > { %1270 = vmatprep.subr.bf16.mxu0 %v1307_v49 }
  0x1d   : > { %1272 = vmatpush3.bf16.msra.mxu0 %v1271_v56 }
  0x1e   : > { %1119 = vmatmul.mubr.msk.f32.gmra.mrb[6].mxu0 %vm283_vm0, %v262_v34  ;;  %1255 = vmatpush3.bf16.msra.mxu1 %v1252_v31 }
  0x1f   : > { %1121 = vmatprep.mubr.msk.f32.mxu0 %vm283_vm0, %v263_v35  ;;  %1257 = vmatprep.subr.bf16.mxu1 %v1256_v36 }
  0x20   : > { %1273 = vmatprep.subr.bf16.mxu0 %v1307_v49 }
  0x21   : > { %1275 = vmatpush3.bf16.msra.mxu0 %v1274_v59 }
  0x22   : > { %1122 = vmatmul.mubr.msk.f32.gmra.mrb[8].mxu0 %vm283_vm0, %v264_v37  ;;  %1259 = vmatpush3.bf16.msra.mxu1 %v1256_v36 }
  0x23   : > { %1124 = vmatprep.mubr.msk.f32.mxu0 %vm283_vm0, %v265_v38  ;;  %1261 = vmatprep.subr.bf16.mxu1 %v1260_v46 }
  0x24   : > { %1276 = vmatprep.subr.bf16.mxu0 %v1307_v49 }
  0x25   : > { %1278 = vmatpush3.bf16.msra.mxu0 %v1277_v62 }
  0x26   : > { %1125 = vmatmul.mubr.msk.f32.gmra.mrb[10].mxu0 %vm283_vm0, %v266_v39  ;;  %1263 = vmatpush3.bf16.msra.mxu1 %v1260_v46 }
  0x27   : > { %1127 = vmatprep.mubr.msk.f32.mxu0 %vm283_vm0, %v267_v40  ;;  %1279 = vmatprep.subr.bf16.mxu0 %v1307_v49 }
  0x29   : > { %1281 = vmatpush3.bf16.msra.mxu0 %v1280_v1 }
  0x2a   : > { %1128 = vmatmul.mubr.msk.f32.gmra.mrb[12].mxu0 %vm283_vm0, %v268_v41  ;;  %1282 = vmatprep.subr.bf16.mxu0 %v1307_v49 }
  0x2b   : > { %1130 = vmatprep.mubr.msk.f32.mxu0 %vm283_vm0, %v269_v42 }
  0x2d   : > { %1284 = vmatpush3.bf16.msra.mxu0 %v1283_v4 }
  0x2e   : > { %1131 = vmatmul.mubr.msk.f32.gmra.mrb[14].mxu0 %vm283_vm0, %v270_v43  ;;  %1285 = vmatprep.subr.bf16.mxu0 %v1307_v49 }
  0x2f   : > { %1221 = vmatprep.mubr.msk.f32.mxu0 %vm1308_vm1, %v1309_v8 }
  0x31   : > { %1287 = vmatpush3.bf16.msra.mxu0 %v1286_v7 }
  0xe5   : > { %v1111_v10 = vpop.f32.mrb[0].mxu0 }
  0xe6   : > { %v404_v11 = vadd.f32 %v1111_v10, %v1507_v9  ;;  %v398_v12 = vpop.f32.mrb[1].mxu0 }
  0xe7   : > { %v399_v13 = vadd.f32 %v1507_v9, %v398_v12 }
  0xe8   : > { %v478_v14 = vmax.f32 %v404_v11, 0.0 }
  0xe9   : > { %v477_v15 = vmax.f32 %v399_v13, 0.0  ;;  %v1114_v16 = vpop.f32.mrb[2].mxu0 }
  0xea   : > { %v414_v17 = vadd.f32 %v1114_v16, %v1507_v9  ;;  %v408_v18 = vpop.f32.mrb[3].mxu0 }
  0xeb   : > { %v493_v19 = vmax.f32 %v477_v15, %v478_v14  ;;  %v409_v20 = vadd.f32 %v1507_v9, %v408_v18  ;;  %1165 = vmatprep.mubr.f32.mxu1 %v477_v15 }
  0xec   : > { %v480_v21 = vmax.f32 %v414_v17, 0.0  ;;  %1166 = vmatmul.mubr.f32.vlgmr.msra.gmra.mrb[0].mxu1 %v478_v14 }
  0xed   : > { %v494_v22 = vrot.slane %v493_v19, 4  ;;  %v479_v23 = vmax.f32 %v409_v20, 0.0  ;;  %v1117_v24 = vpop.f32.mrb[4].mxu0 }
  0xee   : > { %v424_v25 = vadd.f32 %v1117_v24, %v1507_v9  ;;  %v418_v26 = vpop.f32.mrb[5].mxu0 }
  0xef   : > { %v495_v27 = vmax.f32 %v493_v19, %v494_v22  ;;  %v500_v28 = vmax.f32 %v479_v23, %v480_v21  ;;  %v419_v29 = vadd.f32 %v1507_v9, %v418_v26  ;;  %1168 = vmatprep.mubr.f32.mxu1 %v479_v23 }
  0xf0   : > { %v482_v30 = vmax.f32 %v424_v25, 0.0  ;;  %1169 = vmatmul.mubr.f32.gmra.mrb[2].mxu1 %v480_v21 }
  0xf1   : > { %v496_v31 = vrot.slane %v495_v27, 2  ;;  %v501_v32 = vrot.slane %v500_v28, 4  ;;  %v481_v33 = vmax.f32 %v419_v29, 0.0  ;;  %v1120_v34 = vpop.f32.mrb[6].mxu0 }
  0xf2   : > { %v434_v35 = vadd.f32 %v1120_v34, %v1507_v9  ;;  %v428_v36 = vpop.f32.mrb[7].mxu0 }
  0xf3   : > { %v497_v37 = vmax.f32 %v495_v27, %v496_v31  ;;  %v502_v38 = vmax.f32 %v500_v28, %v501_v32  ;;  %v507_v39 = vmax.f32 %v481_v33, %v482_v30  ;;  %v429_v40 = vadd.f32 %v1507_v9, %v428_v36  ;;  %1171 = vmatprep.mubr.f32.mxu1 %v481_v33 }
  0xf4   : > { %v484_v41 = vmax.f32 %v434_v35, 0.0  ;;  %1172 = vmatmul.mubr.f32.gmra.mrb[4].mxu1 %v482_v30 }
  0xf5   : > { %v503_v42 = vrot.slane %v502_v38, 2  ;;  %v508_v43 = vrot.slane %v507_v39, 4  ;;  %v483_v44 = vmax.f32 %v429_v40, 0.0  ;;  %v1123_v45 = vpop.f32.mrb[8].mxu0  ;;  %v498_v46 = vrot.slane %v497_v37, 1 }
  0xf6   : > { %v444_v47 = vadd.f32 %v1123_v45, %v1507_v9  ;;  %v438_v48 = vpop.f32.mrb[9].mxu0 }
  0xf7   : > { %v504_v49 = vmax.f32 %v502_v38, %v503_v42  ;;  %v509_v50 = vmax.f32 %v507_v39, %v508_v43  ;;  %v514_v51 = vmax.f32 %v483_v44, %v484_v41  ;;  %1174 = vmatprep.mubr.f32.mxu1 %v483_v44  ;;  %v439_v53 = vadd.f32 %v1507_v9, %v438_v48 }
  0xf8   : > { %v486_v52 = vmax.f32 %v444_v47, 0.0  ;;  %1175 = vmatmul.mubr.f32.gmra.mrb[6].mxu1 %v484_v41  ;;  %v499_v58 = vmax.f32 %v497_v37, %v498_v46 }
  0xf9   : > { %v505_v54 = vrot.slane %v504_v49, 1  ;;  %v510_v55 = vrot.slane %v509_v50, 2  ;;  %v515_v56 = vrot.slane %v514_v51, 4  ;;  %v1126_v57 = vpop.f32.mrb[10].mxu0  ;;  %v485_v59 = vmax.f32 %v439_v53, 0.0 }
  0xfa   : > { %v454_v60 = vadd.f32 %v1126_v57, %v1507_v9  ;;  %v448_v61 = vpop.f32.mrb[11].mxu0 }
  0xfb   : > { %v506_v62 = vmax.f32 %v504_v49, %v505_v54  ;;  %v511_v63 = vmax.f32 %v509_v50, %v510_v55  ;;  %v516_v0 = vmax.f32 %v514_v51, %v515_v56  ;;  %v449_v1 = vadd.f32 %v1507_v9, %v448_v61  ;;  %1177 = vmatprep.mubr.f32.mxu1 %v485_v59 }
  0xfc   : > { %v521_v2 = vmax.f32 %v485_v59, %v486_v52  ;;  %v488_v3 = vmax.f32 %v454_v60, 0.0  ;;  %1178 = vmatmul.mubr.f32.gmra.mrb[8].mxu1 %v486_v52 }
  0xfd   : > { %v735_v4 = vsel %vm734_vm2, %v506_v62, %v499_v58  ;;  %v512_v5 = vrot.slane %v511_v63, 1  ;;  %v517_v6 = vrot.slane %v516_v0, 2  ;;  %v487_v7 = vmax.f32 %v449_v1, 0.0  ;;  %v1129_v8 = vpop.f32.mrb[12].mxu0 }
  0xfe   : > { %v522_v10 = vrot.slane %v521_v2, 4  ;;  %v464_v11 = vadd.f32 %v1129_v8, %v1507_v9  ;;  %v458_v12 = vpop.f32.mrb[13].mxu0 }
  0xff   : > { %v513_v13 = vmax.f32 %v511_v63, %v512_v5  ;;  %v518_v14 = vmax.f32 %v516_v0, %v517_v6  ;;  %v528_v15 = vmax.f32 %v487_v7, %v488_v3  ;;  %v459_v16 = vadd.f32 %v1507_v9, %v458_v12  ;;  %1180 = vmatprep.mubr.f32.mxu1 %v487_v7 }
 0x100   : > { %v523_v17 = vmax.f32 %v521_v2, %v522_v10  ;;  %v490_v18 = vmax.f32 %v464_v11, 0.0  ;;  %1181 = vmatmul.mubr.f32.gmra.mrb[10].mxu1 %v488_v3 }
 0x101   : > { %v737_v19 = vsel %vm736_vm3, %v513_v13, %v735_v4  ;;  %v519_v20 = vrot.slane %v518_v14, 1  ;;  %v529_v21 = vrot.slane %v528_v15, 4  ;;  %v489_v22 = vmax.f32 %v459_v16, 0.0  ;;  %v1132_v23 = vpop.f32.mrb[14].mxu0 }
 0x102   : > { %v524_v24 = vrot.slane %v523_v17, 2  ;;  %v474_v25 = vadd.f32 %v1132_v23, %v1507_v9  ;;  %v468_v26 = vpop.f32.mrb[15].mxu0 }
 0x103   : > { %v520_v27 = vmax.f32 %v518_v14, %v519_v20  ;;  %v530_v28 = vmax.f32 %v528_v15, %v529_v21  ;;  %v535_v29 = vmax.f32 %v489_v22, %v490_v18  ;;  %v469_v30 = vadd.f32 %v1507_v9, %v468_v26  ;;  %1183 = vmatprep.mubr.f32.mxu1 %v489_v22 }
 0x104   : > { %v525_v31 = vmax.f32 %v523_v17, %v524_v24  ;;  %v492_v32 = vmax.f32 %v474_v25, 0.0  ;;  %1184 = vmatmul.mubr.f32.gmra.mrb[12].mxu1 %v490_v18 }
 0x105   : > { %v739_v33 = vsel %vm738_vm4, %v520_v27, %v737_v19  ;;  %v531_v34 = vrot.slane %v530_v28, 2  ;;  %v536_v35 = vrot.slane %v535_v29, 4  ;;  %v491_v36 = vmax.f32 %v469_v30, 0.0 }
 0x106   : > { %v526_v37 = vrot.slane %v525_v31, 1 }
 0x107   : > { %v532_v38 = vmax.f32 %v530_v28, %v531_v34  ;;  %v537_v39 = vmax.f32 %v535_v29, %v536_v35  ;;  %v542_v40 = vmax.f32 %v491_v36, %v492_v32  ;;  %1186 = vmatprep.mubr.f32.mxu1 %v491_v36 }
 0x108   : > { %v527_v41 = vmax.f32 %v525_v31, %v526_v37  ;;  %1187 = vmatmul.mubr.f32.gmra.mrb[14].mxu1 %v492_v32 }
 0x109   : > { %v533_v42 = vrot.slane %v532_v38, 1  ;;  %v538_v43 = vrot.slane %v537_v39, 2  ;;  %v543_v44 = vrot.slane %v542_v40, 4 }
 0x10a   : > { %v741_v9 = vsel %vm740_vm5, %v527_v41, %v739_v33 }
 0x10b   : > { %v534_v45 = vmax.f32 %v532_v38, %v533_v42  ;;  %v539_v46 = vmax.f32 %v537_v39, %v538_v43  ;;  %v544_v47 = vmax.f32 %v542_v40, %v543_v44 }
 0x10d   : > { %v540_v48 = vrot.slane %v539_v46, 1  ;;  %v545_v49 = vrot.slane %v544_v47, 2  ;;  %v743_v50 = vsel %vm742_vm6, %v534_v45, %v741_v9 }
 0x10f   : > { %v541_v51 = vmax.f32 %v539_v46, %v540_v48  ;;  %v546_v52 = vmax.f32 %v544_v47, %v545_v49 }
 0x111   : > { %v547_v53 = vrot.slane %v546_v52, 1  ;;  %v745_v54 = vsel %vm744_vm7, %v541_v51, %v743_v50 }
 0x113   : > { %v548_v55 = vmax.f32 %v546_v52, %v547_v53 }
 0x115   : > { %v747_v56 = vsel %vm746_vm8, %v548_v55, %v745_v54 }
 0x116   : > { %1222 = vmatmul.mubr.f32.vlgmr.msra.gmra.mrb[16].mxu0 %v747_v56 }
 0x1bf   : > { %v1167_v57 = vpop.f32.mrb[0].mxu1 }
 0x1c0   : > { %v631_v58 = vpop.f32.mrb[1].mxu1 }
 0x1c1   : > { %v819_v59 = vmax.f32 %v631_v58, %v1167_v57 }
 0x1c3   : > { %v1170_v60 = vpop.f32.mrb[2].mxu1  ;;  %v820_v8 = vrot.slane %v819_v59, 4 }
 0x1c4   : > { %v641_v61 = vpop.f32.mrb[3].mxu1 }
 0x1c5   : > { %v826_v62 = vmax.f32 %v641_v61, %v1170_v60  ;;  %v821_v17 = vmax.f32 %v819_v59, %v820_v8 }
 0x1c7   : > { %v1173_v63 = vpop.f32.mrb[4].mxu1  ;;  %v827_v10 = vrot.slane %v826_v62, 4  ;;  %v822_v27 = vrot.slane %v821_v17, 2 }
 0x1c8   : > { %v651_v0 = vpop.f32.mrb[5].mxu1 }
 0x1c9   : > { %v833_v1 = vmax.f32 %v651_v0, %v1173_v63  ;;  %v828_v18 = vmax.f32 %v826_v62, %v827_v10  ;;  %v823_v38 = vmax.f32 %v821_v17, %v822_v27 }
 0x1cb   : > { %v1176_v2 = vpop.f32.mrb[6].mxu1  ;;  %v834_v11 = vrot.slane %v833_v1, 4  ;;  %v829_v28 = vrot.slane %v828_v18, 2  ;;  %v824_v47 = vrot.slane %v823_v38, 1 }
 0x1cc   : > { %v661_v3 = vpop.f32.mrb[7].mxu1 }
 0x1cd   : > { %v840_v4 = vmax.f32 %v661_v3, %v1176_v2  ;;  %v835_v19 = vmax.f32 %v833_v1, %v834_v11  ;;  %v830_v39 = vmax.f32 %v828_v18, %v829_v28  ;;  %v825_v56 = vmax.f32 %v823_v38, %v824_v47  ;;  %v1025_v11 = vld [vmem:[%s1557_s5] ss:$0 sm:$0xff] }
 0x1cf   : > { %v1179_v5 = vpop.f32.mrb[8].mxu1  ;;  %v841_v13 = vrot.slane %v840_v4, 4  ;;  %v836_v29 = vrot.slane %v835_v19, 2  ;;  %v831_v48 = vrot.slane %v830_v39, 1 }
 0x1d0   : > { %v671_v6 = vpop.f32.mrb[9].mxu1 }
 0x1d1   : > { %v847_v7 = vmax.f32 %v671_v6, %v1179_v5  ;;  %v842_v22 = vmax.f32 %v840_v4, %v841_v13  ;;  %v837_v40 = vmax.f32 %v835_v19, %v836_v29  ;;  %v832_v57 = vmax.f32 %v830_v39, %v831_v48 }
 0x1d3   : > { %v1182_v12 = vpop.f32.mrb[10].mxu1  ;;  %v848_v14 = vrot.slane %v847_v7, 4  ;;  %v843_v32 = vrot.slane %v842_v22, 2  ;;  %v838_v49 = vrot.slane %v837_v40, 1 }
 0x1d4   : > { %v681_v15 = vpop.f32.mrb[11].mxu1 }
 0x1d5   : > { %v854_v16 = vmax.f32 %v681_v15, %v1182_v12  ;;  %v849_v23 = vmax.f32 %v847_v7, %v848_v14  ;;  %v844_v43 = vmax.f32 %v842_v22, %v843_v32  ;;  %v839_v58 = vmax.f32 %v837_v40, %v838_v49 }
 0x1d7   : > { %v855_v20 = vrot.slane %v854_v16, 4  ;;  %v1185_v21 = vpop.f32.mrb[12].mxu1  ;;  %v850_v33 = vrot.slane %v849_v23, 2  ;;  %v845_v51 = vrot.slane %v844_v43, 1 }
 0x1d8   : > { %v691_v24 = vpop.f32.mrb[13].mxu1 }
 0x1d9   : > { %v856_v25 = vmax.f32 %v854_v16, %v855_v20  ;;  %v861_v26 = vmax.f32 %v691_v24, %v1185_v21  ;;  %v851_v44 = vmax.f32 %v849_v23, %v850_v33  ;;  %v846_v60 = vmax.f32 %v844_v43, %v845_v51 }
 0x1db   : > { %v862_v30 = vrot.slane %v861_v26, 4  ;;  %v1188_v31 = vpop.f32.mrb[14].mxu1  ;;  %v857_v34 = vrot.slane %v856_v25, 2  ;;  %v852_v52 = vrot.slane %v851_v44, 1 }
 0x1dc   : > { %v701_v35 = vpop.f32.mrb[15].mxu1 }
 0x1dd   : > { %v863_v36 = vmax.f32 %v861_v26, %v862_v30  ;;  %v868_v37 = vmax.f32 %v701_v35, %v1188_v31  ;;  %v858_v9 = vmax.f32 %v856_v25, %v857_v34  ;;  %v853_v61 = vmax.f32 %v851_v44, %v852_v52 }
 0x1df   : > { %v864_v41 = vrot.slane %v863_v36, 2  ;;  %v869_v42 = vrot.slane %v868_v37, 4  ;;  %v859_v53 = vrot.slane %v858_v9, 1 }
 0x1e1   : > { %v865_v45 = vmax.f32 %v863_v36, %v864_v41  ;;  %v870_v46 = vmax.f32 %v868_v37, %v869_v42  ;;  %v860_v62 = vmax.f32 %v858_v9, %v859_v53 }
 0x1e3   : > { %v871_v50 = vrot.slane %v870_v46, 2  ;;  %v866_v54 = vrot.slane %v865_v45, 1 }
 0x1e5   : > { %v872_v55 = vmax.f32 %v870_v46, %v871_v50  ;;  %v867_v63 = vmax.f32 %v865_v45, %v866_v54 }
 0x1e7   : > { %v873_v59 = vrot.slane %v872_v55, 1 }
 0x1e9   : > { %v815_v0 = vpop.f32.mrb[16].mxu0  ;;  %v874_v1 = vmax.f32 %v872_v55, %v873_v59 }
 0x1ea   : > { %v876_v2 = vrot.slane %v815_v0, 1  ;;  %v877_v3 = vrot.slane %v815_v0, 2  ;;  %v878_v4 = vrot.slane %v815_v0, 3  ;;  %v1223_v5 = vpop.f32.mrb[17].mxu0  ;;  %v879_v6 = vrot.slane %v815_v0, 4 }
 0x1eb   : > { %v880_v7 = vrot.slane %v815_v0, 5  ;;  %v881_v8 = vrot.slane %v815_v0, 6  ;;  %v882_v10 = vrot.slane %v815_v0, 7  ;;  %v891_v12 = vadd.f32 %v825_v56, %v815_v0 }
 0x1ec   : > { %v892_v13 = vadd.f32 %v876_v2, %v832_v57  ;;  %v893_v14 = vadd.f32 %v877_v3, %v839_v58  ;;  %v894_v15 = vadd.f32 %v878_v4, %v846_v60  ;;  %v895_v16 = vadd.f32 %v879_v6, %v853_v61 }
 0x1ed   : > { %v896_v17 = vadd.f32 %v880_v7, %v860_v62  ;;  %v897_v18 = vadd.f32 %v881_v8, %v867_v63  ;;  %v898_v19 = vadd.f32 %v882_v10, %v874_v1  ;;  %v906_v20 = vadd.f32 %v1025_v11, %v891_v12 }
 0x1ee   : > { %v907_v21 = vadd.f32 %v1025_v11, %v892_v13  ;;  %v908_v22 = vadd.f32 %v1025_v11, %v893_v14  ;;  %v909_v23 = vadd.f32 %v1025_v11, %v894_v15  ;;  %v910_v24 = vadd.f32 %v1025_v11, %v895_v16 }
 0x1ef   : > { %v911_v25 = vadd.f32 %v1025_v11, %v896_v17  ;;  %v912_v26 = vadd.f32 %v1025_v11, %v897_v18  ;;  %v913_v27 = vadd.f32 %v1025_v11, %v898_v19  ;;  %v914_v32 = vmax.f32 %v906_v20, 0.0 }
 0x1f0   : > { %v915_v28 = vmax.f32 %v907_v21, 0.0  ;;  %v916_v29 = vmax.f32 %v908_v22, 0.0  ;;  %v917_v30 = vmax.f32 %v909_v23, 0.0  ;;  %v918_v31 = vmax.f32 %v910_v24, 0.0 }
 0x1f1   : > { %v919_v33 = vmax.f32 %v911_v25, 0.0  ;;  %v920_v36 = vmax.f32 %v912_v26, 0.0  ;;  %v921_v37 = vmax.f32 %v913_v27, 0.0 }
 0x1f2   : > { %v930_v34 = vrot.slane %v915_v28, 7  ;;  %v932_v35 = vrot.slane %v916_v29, 6  ;;  %v934_v39 = vrot.slane %v917_v30, 5  ;;  %v936_v41 = vrot.slane %v918_v31, 4 }
 0x1f3   : > { %v938_v43 = vrot.slane %v919_v33, 3  ;;  %v940_v9 = vrot.slane %v920_v36, 2  ;;  %v942_v46 = vrot.slane %v921_v37, 1 }
 0x1f4   : > { %v931_v38 = vsel %vm734_vm2, %v930_v34, %v914_v32 }
 0x1f5   : > { %v933_v40 = vsel %vm736_vm3, %v932_v35, %v931_v38 }
 0x1f6   : > { %v935_v42 = vsel %vm738_vm4, %v934_v39, %v933_v40 }
 0x1f7   : > { %v937_v44 = vsel %vm740_vm5, %v936_v41, %v935_v42 }
 0x1f8   : > { %v939_v45 = vsel %vm742_vm6, %v938_v43, %v937_v44 }
 0x1f9   : > { %v941_v47 = vsel %vm744_vm7, %v940_v9, %v939_v45 }
 0x1fa   : > { %v943_v48 = vsel %vm746_vm8, %v942_v46, %v941_v47 }
 0x1fb   : > { %945 = vst [vmem:[%s254_s19] sm:$0xff] %v943_v48 }
 0x1fc PF: > { %s16_s21 = sadd.s32 1, %s1305_s21  }
 0x1fd   : > { %p13_p5 = scmp.ge.s32.totalorder %s16_s21, 4  }
 0x1ff   :  { %15 = sbr.rel (!%p13_p5) target bundleno = 1 (0x1), region = 74 }

</bundles_post_ra>
